<compile_context>
chip_gen: v7x
topology: tpu7x:2x2x1
jax: 0.10.0
libtpu: 0.0.40
codegen_flags: <defaults>
</compile_context>

<pallas_src>
import functools

import jax
import jax.numpy as jnp
from jax.experimental import pallas as pl
from jax.experimental.pallas import tpu as pltpu


def _round_up(x, m):
    return ((x + m - 1) // m) * m


def critic_kernel(s_ref, a_ref, w1s_ref, w1a_ref, b1_ref,
                  w2_ref, b2_ref, w3_ref, b3_ref, out_ref):
    # ----- Layer 1: state @ W1s + action @ W1a + b1, ReLU ------------------
    # bf16 operands into the MXU, f32 accumulation.
    h1 = jnp.dot(s_ref[...], w1s_ref[...], preferred_element_type=jnp.float32)
    h1 = h1 + jnp.dot(a_ref[...], w1a_ref[...],
                      preferred_element_type=jnp.float32)
    h1 = jnp.maximum(h1 + b1_ref[...], 0.0)          # f32 bias-add / ReLU

    # ----- Layer 2: h1 @ W2 + b2, ReLU --------------------------------------
    h2 = jnp.dot(h1.astype(jnp.bfloat16), w2_ref[...],
                 preferred_element_type=jnp.float32)
    h2 = jnp.maximum(h2 + b2_ref[...], 0.0)

    # ----- Layer 3: 1-wide output -> VPU multiply + XLU lane reduce ---------
    # (avoids a 1/256-utilization MXU matmul and its masked result pop)
    w3_row = w3_ref[...].astype(jnp.float32)          # [1, 256]
    q = jnp.sum(h2 * w3_row, axis=-1, keepdims=True) + b3_ref[...]
    out_ref[...] = q.astype(out_ref.dtype)


def critic_forward(state, action, packed_params, *, block_batch=512):
    """Pallas forward pass.

    state:  [B, S] float32
    action: [B, A] float32
    packed_params: (w1s, w1a, b1, w2, b2, w3_row, b3) — bf16 weights,
                   f32 biases (see pack_params).
    """
    w1s, w1a, b1, w2, b2, w3_row, b3 = packed_params
    B, S = state.shape
    A = action.shape[1]

    # Batch tile: multiple of 8, capped so tiles + resident weights +
    # f32 temporaries stay far below v7x's 32 MiB scoped-VMEM default.
    bm = min(block_batch, _round_up(B, 8))
    B_pad = _round_up(B, bm)

    s = state.astype(jnp.bfloat16)   # halves x-tile DMA bytes
    a = action.astype(jnp.bfloat16)
    if B_pad != B:
        s = jnp.pad(s, ((0, B_pad - B), (0, 0)))
        a = jnp.pad(a, ((0, B_pad - B), (0, 0)))

    # Weights/biases: constant block index -> fetched once, VMEM-resident.
    resident = lambda arr: pl.BlockSpec(arr.shape,
                                        lambda i: (0,) * arr.ndim)

    q = pl.pallas_call(
        critic_kernel,
        out_shape=jax.ShapeDtypeStruct((B_pad, 1), jnp.float32),
        grid=(B_pad // bm,),
        in_specs=[
            pl.BlockSpec((bm, S), lambda i: (i, 0)),   # state tile
            pl.BlockSpec((bm, A), lambda i: (i, 0)),   # action tile
            resident(w1s), resident(w1a), resident(b1),
            resident(w2), resident(b2),
            resident(w3_row), resident(b3),
        ],
        out_specs=pl.BlockSpec((bm, 1), lambda i: (i, 0)),
        compiler_params=pltpu.CompilerParams(
            dimension_semantics=("parallel",)),        # megacore on v7x
    )(s, a, w1s, w1a, b1, w2, b2, w3_row, b3)

    return q[:B]


def init_params(key, state_dim, action_dim, hidden=256):
    """Deterministic synthetic init matching nn.Linear shapes (f32, [in,out])."""
    in1 = state_dim + action_dim
    ks = jax.random.split(key, 6)

    def uniform(k, shape, fan_in):
        bound = 1.0 / jnp.sqrt(jnp.float32(fan_in))
        return jax.random.uniform(k, shape, jnp.float32, -bound, bound)

    w1 = uniform(ks[0], (in1, hidden), in1)
    b1 = uniform(ks[1], (1, hidden), in1)
    w2 = uniform(ks[2], (hidden, hidden), hidden)
    b2 = uniform(ks[3], (1, hidden), hidden)
    w3 = uniform(ks[4], (hidden, 1), hidden)
    b3 = uniform(ks[5], (1, 1), hidden)
    return (w1, b1, w2, b2, w3, b3)


def pack_params(params, state_dim):
    """Split W1 by (state | action), cast weights to bf16, keep f32 biases.

    w3 is stored as a [1, hidden] row so layer 3 becomes a lane-reduction.
    """
    w1, b1, w2, b2, w3, b3 = params
    w1s = w1[:state_dim].astype(jnp.bfloat16)          # [S, 256]
    w1a = w1[state_dim:].astype(jnp.bfloat16)          # [A, 256]
    w2b = w2.astype(jnp.bfloat16)                      # [256, 256]
    w3r = jnp.transpose(w3).astype(jnp.bfloat16)       # [1, 256]
    return (w1s, w1a, b1, w2b, b2, w3r, b3)


def critic_reference(state, action, params):
    """Pure-JAX f32 reference mirroring the PyTorch forward exactly."""
    w1, b1, w2, b2, w3, b3 = params
    x = jnp.concatenate([state, action], axis=1)
    x = jax.nn.relu(x @ w1 + b1)
    x = jax.nn.relu(x @ w2 + b2)
    return x @ w3 + b3


if __name__ == "__main__":
    key = jax.random.PRNGKey(0)
    k_param, k_state, k_action = jax.random.split(key, 3)

    batch, state_dim, action_dim = 8, 16, 8

    params = init_params(k_param, state_dim, action_dim)
    packed = pack_params(params, state_dim)

    state = jax.random.normal(k_state, (batch, state_dim), jnp.float32)
    action = jax.random.normal(k_action, (batch, action_dim), jnp.float32)

    q = critic_forward(state, action, packed)
    q = jax.block_until_ready(q)

    q_ref = critic_reference(state, action, params)
    assert q.shape == (batch, 1)
    # bf16 matmul inputs with f32 accumulation -> loosened tolerance vs f32 ref.
    assert jnp.allclose(q, q_ref, atol=5e-2, rtol=5e-2), "mismatch vs reference"

    print("KERNEL_OK")
</pallas_src>

<mosaic_0001>
module attributes {stable_mosaic.version = 11 : i64} {
  func.func @critic_kernel(%arg0: i32, %arg1: memref<8x16xbf16, #tpu.memory_space<vmem>>, %arg2: memref<8x8xbf16, #tpu.memory_space<vmem>>, %arg3: memref<16x256xbf16, #tpu.memory_space<vmem>>, %arg4: memref<8x256xbf16, #tpu.memory_space<vmem>>, %arg5: memref<1x256xf32, #tpu.memory_space<vmem>>, %arg6: memref<256x256xbf16, #tpu.memory_space<vmem>>, %arg7: memref<1x256xf32, #tpu.memory_space<vmem>>, %arg8: memref<1x256xbf16, #tpu.memory_space<vmem>>, %arg9: memref<1x1xf32, #tpu.memory_space<vmem>>, %arg10: memref<8x1xf32, #tpu.memory_space<vmem>>) attributes {dimension_semantics = [#tpu.dimension_semantics<parallel>], iteration_bounds = array<i64: 1>, scalar_prefetch = 0 : i64, scratch_operands = 0 : i64, tpu.core_type = #tpu.core_type<tc>, window_params = [{transform_indices = @transform_0, window_bounds = array<i64: 8, 16>}, {transform_indices = @transform_1, window_bounds = array<i64: 8, 8>}, {pipeline_mode = #tpu.pipeline_mode<synchronous>, transform_indices = @transform_2, window_bounds = array<i64: 16, 256>}, {pipeline_mode = #tpu.pipeline_mode<synchronous>, transform_indices = @transform_3, window_bounds = array<i64: 8, 256>}, {pipeline_mode = #tpu.pipeline_mode<synchronous>, transform_indices = @transform_4, window_bounds = array<i64: 1, 256>}, {pipeline_mode = #tpu.pipeline_mode<synchronous>, transform_indices = @transform_5, window_bounds = array<i64: 256, 256>}, {pipeline_mode = #tpu.pipeline_mode<synchronous>, transform_indices = @transform_6, window_bounds = array<i64: 1, 256>}, {pipeline_mode = #tpu.pipeline_mode<synchronous>, transform_indices = @transform_7, window_bounds = array<i64: 1, 256>}, {pipeline_mode = #tpu.pipeline_mode<synchronous>, transform_indices = @transform_8, window_bounds = array<i64: 1, 1>}, {transform_indices = @transform_9, window_bounds = array<i64: 8, 1>}]} {
    %c0 = arith.constant 0 : index
    %c0_0 = arith.constant 0 : index
    %0 = vector.load %arg1[%c0, %c0_0] : memref<8x16xbf16, #tpu.memory_space<vmem>>, vector<8x16xbf16>
    %c0_1 = arith.constant 0 : index
    %c0_2 = arith.constant 0 : index
    %1 = vector.load %arg3[%c0_1, %c0_2] : memref<16x256xbf16, #tpu.memory_space<vmem>>, vector<16x256xbf16>
    %cst = arith.constant dense<0.000000e+00> : vector<8x256xf32>
    %2 = tpu.matmul %0, %1, %cst {dimension_numbers = #tpu.dot_dimension_numbers<[1], [0], [0], [1], [0, 0, 1, 1], [], []>} : vector<8x16xbf16>, vector<16x256xbf16>, vector<8x256xf32> -> vector<8x256xf32>
    %c0_3 = arith.constant 0 : index
    %c0_4 = arith.constant 0 : index
    %3 = vector.load %arg2[%c0_3, %c0_4] : memref<8x8xbf16, #tpu.memory_space<vmem>>, vector<8x8xbf16>
    %c0_5 = arith.constant 0 : index
    %c0_6 = arith.constant 0 : index
    %4 = vector.load %arg4[%c0_5, %c0_6] : memref<8x256xbf16, #tpu.memory_space<vmem>>, vector<8x256xbf16>
    %cst_7 = arith.constant dense<0.000000e+00> : vector<8x256xf32>
    %5 = tpu.matmul %3, %4, %cst_7 {dimension_numbers = #tpu.dot_dimension_numbers<[1], [0], [0], [1], [0, 0, 1, 1], [], []>} : vector<8x8xbf16>, vector<8x256xbf16>, vector<8x256xf32> -> vector<8x256xf32>
    %6 = arith.addf %2, %5 : vector<8x256xf32>
    %c0_8 = arith.constant 0 : index
    %c0_9 = arith.constant 0 : index
    %7 = vector.load %arg5[%c0_8, %c0_9] : memref<1x256xf32, #tpu.memory_space<vmem>>, vector<1x256xf32>
    %8 = vector.broadcast %7 : vector<1x256xf32> to vector<8x256xf32>
    %9 = arith.addf %6, %8 : vector<8x256xf32>
    %cst_10 = arith.constant 0.000000e+00 : f32
    %10 = vector.broadcast %cst_10 : f32 to vector<8x256xf32>
    %11 = arith.maximumf %9, %10 : vector<8x256xf32>
    %12 = arith.truncf %11 : vector<8x256xf32> to vector<8x256xbf16>
    %c0_11 = arith.constant 0 : index
    %c0_12 = arith.constant 0 : index
    %13 = vector.load %arg6[%c0_11, %c0_12] : memref<256x256xbf16, #tpu.memory_space<vmem>>, vector<256x256xbf16>
    %cst_13 = arith.constant dense<0.000000e+00> : vector<8x256xf32>
    %14 = tpu.matmul %12, %13, %cst_13 {dimension_numbers = #tpu.dot_dimension_numbers<[1], [0], [0], [1], [0, 0, 1, 1], [], []>} : vector<8x256xbf16>, vector<256x256xbf16>, vector<8x256xf32> -> vector<8x256xf32>
    %c0_14 = arith.constant 0 : index
    %c0_15 = arith.constant 0 : index
    %15 = vector.load %arg7[%c0_14, %c0_15] : memref<1x256xf32, #tpu.memory_space<vmem>>, vector<1x256xf32>
    %16 = vector.broadcast %15 : vector<1x256xf32> to vector<8x256xf32>
    %17 = arith.addf %14, %16 : vector<8x256xf32>
    %cst_16 = arith.constant 0.000000e+00 : f32
    %18 = vector.broadcast %cst_16 : f32 to vector<8x256xf32>
    %19 = arith.maximumf %17, %18 : vector<8x256xf32>
    %c0_17 = arith.constant 0 : index
    %c0_18 = arith.constant 0 : index
    %20 = vector.load %arg8[%c0_17, %c0_18] : memref<1x256xbf16, #tpu.memory_space<vmem>>, vector<1x256xbf16>
    %21 = arith.extf %20 : vector<1x256xbf16> to vector<1x256xf32>
    %22 = vector.broadcast %21 : vector<1x256xf32> to vector<8x256xf32>
    %23 = arith.mulf %19, %22 : vector<8x256xf32>
    %cst_19 = arith.constant dense<0.000000e+00> : vector<8xf32>
    %24 = vector.multi_reduction <add>, %23, %cst_19 [1] : vector<8x256xf32> to vector<8xf32>
    %25 = vector.shape_cast %24 : vector<8xf32> to vector<8x1xf32>
    %c0_20 = arith.constant 0 : index
    %c0_21 = arith.constant 0 : index
    %26 = vector.load %arg9[%c0_20, %c0_21] : memref<1x1xf32, #tpu.memory_space<vmem>>, vector<1x1xf32>
    %27 = vector.broadcast %26 : vector<1x1xf32> to vector<8x1xf32>
    %28 = arith.addf %25, %27 : vector<8x1xf32>
    %c0_22 = arith.constant 0 : index
    %c0_23 = arith.constant 0 : index
    %29 = vector.load %arg10[%c0_22, %c0_23] : memref<8x1xf32, #tpu.memory_space<vmem>>, vector<8x1xf32>
    tpu.vector_store %arg10[%c0_22, %c0_23], %28 {strides = array<i32>} : memref<8x1xf32, #tpu.memory_space<vmem>>, vector<8x1xf32>,
    return
  }
  func.func @transform_0(%arg0: i32) -> (i32, i32) {
    %c0_i32 = arith.constant 0 : i32
    %c0_i32_0 = arith.constant 0 : i32
    return %arg0, %c0_i32 : i32, i32
  }
  func.func @transform_1(%arg0: i32) -> (i32, i32) {
    %c0_i32 = arith.constant 0 : i32
    %c0_i32_0 = arith.constant 0 : i32
    return %arg0, %c0_i32 : i32, i32
  }
  func.func @transform_2(%arg0: i32) -> (i32, i32) {
    %c0_i32 = arith.constant 0 : i32
    %c0_i32_0 = arith.constant 0 : i32
    %c0_i32_1 = arith.constant 0 : i32
    return %c0_i32, %c0_i32_0 : i32, i32
  }
  func.func @transform_3(%arg0: i32) -> (i32, i32) {
    %c0_i32 = arith.constant 0 : i32
    %c0_i32_0 = arith.constant 0 : i32
    %c0_i32_1 = arith.constant 0 : i32
    return %c0_i32, %c0_i32_0 : i32, i32
  }
  func.func @transform_4(%arg0: i32) -> (i32, i32) {
    %c0_i32 = arith.constant 0 : i32
    %c0_i32_0 = arith.constant 0 : i32
    %c0_i32_1 = arith.constant 0 : i32
    return %c0_i32, %c0_i32_0 : i32, i32
  }
  func.func @transform_5(%arg0: i32) -> (i32, i32) {
    %c0_i32 = arith.constant 0 : i32
    %c0_i32_0 = arith.constant 0 : i32
    %c0_i32_1 = arith.constant 0 : i32
    return %c0_i32, %c0_i32_0 : i32, i32
  }
  func.func @transform_6(%arg0: i32) -> (i32, i32) {
    %c0_i32 = arith.constant 0 : i32
    %c0_i32_0 = arith.constant 0 : i32
    %c0_i32_1 = arith.constant 0 : i32
    return %c0_i32, %c0_i32_0 : i32, i32
  }
  func.func @transform_7(%arg0: i32) -> (i32, i32) {
    %c0_i32 = arith.constant 0 : i32
    %c0_i32_0 = arith.constant 0 : i32
    %c0_i32_1 = arith.constant 0 : i32
    return %c0_i32, %c0_i32_0 : i32, i32
  }
  func.func @transform_8(%arg0: i32) -> (i32, i32) {
    %c0_i32 = arith.constant 0 : i32
    %c0_i32_0 = arith.constant 0 : i32
    %c0_i32_1 = arith.constant 0 : i32
    return %c0_i32, %c0_i32_0 : i32, i32
  }
  func.func @transform_9(%arg0: i32) -> (i32, i32) {
    %c0_i32 = arith.constant 0 : i32
    %c0_i32_0 = arith.constant 0 : i32
    return %arg0, %c0_i32 : i32, i32
  }
}

</mosaic_0001>

<bundles_post_ra>
// kernel: tpu_custom_call.1
= control target key start
LH: loop header
LB: loop body
LE: loop exit
PB: predicated region body
PF: predicated region fallthrough
CT: control target
= control target key end

     0   :  { %s786_s0 = inlined_call_operand.hbm [shape: bf16[8,16], index: 0, kind: input, shape index: {}]   ;;  %s787_s1 = inlined_call_operand.vmem [shape: bf16[8,8], index: 1, kind: input, shape index: {}]   ;;  %s788_s2 = inlined_call_operand.hbm [shape: bf16[16,256], index: 2, kind: input, shape index: {}]   ;;  %s789_s3 = inlined_call_operand.vmem [shape: bf16[8,256], index: 3, kind: input, shape index: {}]   ;;  %s790_s4 = inlined_call_operand.vmem [shape: f32[1,256], index: 4, kind: input, shape index: {}]   ;;  %s791_s5 = inlined_call_operand.hbm [shape: bf16[256,256], index: 5, kind: input, shape index: {}]   ;;  %s792_s6 = inlined_call_operand.vmem [shape: f32[1,256], index: 6, kind: input, shape index: {}]   ;;  %s793_s7 = inlined_call_operand.vmem [shape: bf16[1,256], index: 7, kind: input, shape index: {}]   ;;  %s794_s8 = inlined_call_operand.<no memory space> [shape: f32[1,1], index: 8, kind: input, shape index: {}]   ;;  %s795_s9 = inlined_call_operand.vmem [shape: f32[8,1], index: 9, kind: output, shape index: {}]  }
   0x1   :  { %v14_v0 = vstv %s794_s8 }
   0x2   :  { %15 = vst [vmem:[#allocation2] sm:$0x1] %v14_v0 }
   0x3   :  { %16 = vsyncpa [#allocation4], 0 }
   0x4   :  { %17 = vsyncpa [#allocation6], 0  ;;  %s667_s11 = smov [#allocation5]   ;;  %s597_s15 = scalar_lea.hbm %s788_s2, 256 }
   0x5   :  { %s35_s12 = sshll.u32 %s667_s11, 4  ;;  %p598_p0 = scmp.ne.s32.totalorder %s788_s2, %s597_s15  ;;  %s36_s12 = int_to_ptr.vmem [resolvable:$true] %s35_s12 }
   0x6   :  { %p601_p1 = scmp.lt.u32.totalorder %s597_s15, %s788_s2 }
   0x8   :  { %p603_p2 = pnand %p601_p1, %p598_p0 }
   0xa   :  { %606 = shalt.err (!%p603_p2)
}
   0xb   :  { %s607_s8 = scalar_lea.vmem %s36_s12, 256  ;;  %p612_p4 = scmp.lt.s32.totalorder %s36_s12, %s36_s12 }
   0xc   :  { %p608_p3 = scmp.ne.s32.totalorder %s36_s12, %s607_s8  ;;  %p613_p5 = scmp.lt.s32.totalorder %s607_s8, %s607_s8 }
   0xe   :  { %p614_p6 = por %p613_p5, %p612_p4 }
  0x10   :  { %p615_p7 = pnand %p614_p6, %p608_p3 }
  0x12   :  { %618 = shalt.err (!%p615_p7)
}
  0x13   :  { %s668_s20 = smov 128   ;;  %s669_s21 = smov 8  }
  0x14   :  { %41 = dma.hbm_to_vmem [thread:$0]  %s788_s2, 256, %s36_s12, [#allocation6], %s668_s20, %s668_s20, %s669_s21  }
  0x15   :  { %s670_s24 = smov [#allocation3]   ;;  %s671_s26 = smov [#allocation7]  }
  0x16   :  { %s24_s25 = sshll.u32 %s670_s24, 4  ;;  %s51_s27 = sshll.u32 %s671_s26, 4  ;;  %s25_s25 = int_to_ptr.vmem [resolvable:$true] %s24_s25  ;;  %s52_s27 = int_to_ptr.vmem [resolvable:$true] %s51_s27 }
  0x17   :  { %s619_s30 = scalar_lea.hbm %s786_s0, 64 }
  0x18   :  { %p620_p8 = scmp.ne.s32.totalorder %s786_s0, %s619_s30  ;;  %p623_p9 = scmp.lt.u32.totalorder %s619_s30, %s786_s0 }
  0x1a   :  { %p625_p10 = pnand %p623_p9, %p620_p8 }
  0x1c   :  { %628 = shalt.err (!%p625_p10)
}
  0x1d   :  { %s629_s2 = scalar_lea.vmem %s25_s25, 64  ;;  %p634_p12 = scmp.lt.s32.totalorder %s25_s25, %s25_s25 }
  0x1e   :  { %p630_p11 = scmp.ne.s32.totalorder %s25_s25, %s629_s2  ;;  %p635_p13 = scmp.lt.s32.totalorder %s629_s2, %s629_s2 }
  0x20   :  { %p636_p0 = por %p635_p13, %p634_p12 }
  0x22   :  { %p637_p1 = pnand %p636_p0, %p630_p11 }
  0x24   :  { %640 = shalt.err (!%p637_p1)
}
  0x25   :  { %27 = dma.hbm_to_vmem [thread:$0]  %s786_s0, 64, %s25_s25, [#allocation4]  }
  0x26   :  { %s641_s18 = scalar_lea.hbm %s791_s5, 4096 }
  0x27   :  { %p642_p2 = scmp.ne.s32.totalorder %s791_s5, %s641_s18  ;;  %p645_p3 = scmp.lt.u32.totalorder %s641_s18, %s791_s5 }
  0x29   :  { %p647_p4 = pnand %p645_p3, %p642_p2 }
  0x2b   :  { %650 = shalt.err (!%p647_p4)
}
  0x2c   :  { %s651_s24 = scalar_lea.vmem %s52_s27, 4096  ;;  %p656_p6 = scmp.lt.s32.totalorder %s52_s27, %s52_s27 }
  0x2d   :  { %p652_p5 = scmp.ne.s32.totalorder %s52_s27, %s651_s24  ;;  %p657_p7 = scmp.lt.s32.totalorder %s651_s24, %s651_s24 }
  0x2f   :  { %p658_p8 = por %p657_p7, %p656_p6 }
  0x31   :  { %p659_p9 = pnand %p658_p8, %p652_p5 }
  0x33   :  { %662 = shalt.err (!%p659_p9)
}
  0x34   :  { %57 = dma.hbm_to_vmem [thread:$0]  %s791_s5, 4096, %s52_s27, [#allocation6], %s668_s20, %s668_s20, %s669_s21  }
  0x35   :  { %663 = dma.done.wait [#allocation4], 64  }
  0x36   :  { %664 = vsyncadd [#allocation4], 4294967232 }
  0x37   :  { %665 = dma.done.wait [#allocation6], 4352  }
  0x38   :  { %666 = vsyncadd [#allocation6], 4294962944  ;;  %v672_v1 = vmov 0   ;;  %v78_v2 = vld [vmem:[%s789_s3] sm:$0xff]  ;;  %vm88_vm0 = vcmask 1043456   ;;  %vm84_vm1 = vcmask 64512   ;;  %v193_v42 = vlaneseq }
  0x39   :  { %127 = vmatprep.mubr.bf16.mxu1 %v672_v1  ;;  %v499_v3 = vcombine.high %v78_v2, %v78_v2  ;;  %v498_v4 = vcombine.low %v78_v2, %v78_v2  ;;  %v548_v5 = vld [vmem:[#allocation5 + $0x4] ss:$8 sps:$4 sm:$0xff]   ;;  %v77_v6 = vld [vmem:[%s787_s1] sm:$0xf]  ;;  %v546_v10 = vld [vmem:[#allocation5] ss:$8 sps:$4 sm:$0xff]  }
  0x3a   :  { %v549_v8 = vld [vmem:[#allocation7 + $0x4] ss:$8 sps:$4 sm:$0xff]   ;;  %v551_v9 = vld [vmem:[#allocation7] ss:$8 sps:$4 sm:$0xff]   ;;  %v552_v11 = vld [vmem:[#allocation7 + $0x14] ss:$8 sps:$4 sm:$0xff]  }
  0x3b   :  { %500 = vmatprep.subr.msk.bf16.mxu1 %vm88_vm0, %v499_v3  ;;  %v90_v7 = vsel %vm88_vm0, %v498_v4, 0  ;;  %413 = vmatprep.subr.bf16.mxu0 %v549_v8  ;;  %v554_v12 = vld [vmem:[#allocation7 + $0x10] ss:$8 sps:$4 sm:$0xff]   ;;  %v555_v13 = vld [vmem:[#allocation7 + $0x24] ss:$8 sps:$4 sm:$0xff]   ;;  %vm146_vm2 = vcmask 130048  }
  0x3c   :  { %96 = vmatpush1.bf16.msra.mxu1 %v90_v7  ;;  %414 = vmatpush1.bf16.msra.mxu0 %v551_v9  ;;  %v557_v14 = vld [vmem:[#allocation7 + $0x20] ss:$8 sps:$4 sm:$0xff]   ;;  %v558_v15 = vld [vmem:[#allocation7 + $0x34] ss:$8 sps:$4 sm:$0xff]   ;;  %v74_v16 = vld [vmem:[#allocation3] sm:$0xf] }
  0x3d   :  { %150 = vmatprep.subr.bf16.mxu1 %v548_v5  ;;  %415 = vmatprep.subr.bf16.mxu0 %v552_v11  ;;  %v560_v17 = vld [vmem:[#allocation7 + $0x30] ss:$8 sps:$4 sm:$0xff]   ;;  %v561_v18 = vld [vmem:[#allocation7 + $0x44] ss:$8 sps:$4 sm:$0xff]   ;;  %v563_v19 = vld [vmem:[#allocation7 + $0x40] ss:$8 sps:$4 sm:$0xff]  }
  0x3e   :  { %v564_v20 = vld [vmem:[#allocation7 + $0x54] ss:$8 sps:$4 sm:$0xff]   ;;  %v566_v21 = vld [vmem:[#allocation7 + $0x50] ss:$8 sps:$4 sm:$0xff]   ;;  %v567_v22 = vld [vmem:[#allocation7 + $0x64] ss:$8 sps:$4 sm:$0xff]  }
  0x3f   :  { %501 = vmatmul.mubr.msk.bf16.vlgmr.msra.gmra.mrb[0].mxu1 %vm84_vm1, %v77_v6  ;;  %v569_v23 = vld [vmem:[#allocation7 + $0x60] ss:$8 sps:$4 sm:$0xff]   ;;  %v570_v24 = vld [vmem:[#allocation7 + $0x74] ss:$8 sps:$4 sm:$0xff]   ;;  %v572_v25 = vld [vmem:[#allocation7 + $0x70] ss:$8 sps:$4 sm:$0xff]  }
  0x40   :  { %151 = vmatpush1.bf16.msra.mxu1 %v546_v10  ;;  %182 = vmatprep.mubr.bf16.mxu1 %v672_v1  ;;  %v573_v26 = vld [vmem:[#allocation7 + $0x84] ss:$8 sps:$4 sm:$0xff]   ;;  %v575_v27 = vld [vmem:[#allocation7 + $0x80] ss:$8 sps:$4 sm:$0xff]   ;;  %v576_v28 = vld [vmem:[#allocation7 + $0x94] ss:$8 sps:$4 sm:$0xff]  }
  0x41   :  { %416 = vmatpush1.bf16.msra.mxu0 %v554_v12  ;;  %v578_v29 = vld [vmem:[#allocation7 + $0x90] ss:$8 sps:$4 sm:$0xff]   ;;  %v579_v30 = vld [vmem:[#allocation7 + $0xa4] ss:$8 sps:$4 sm:$0xff]   ;;  %v581_v31 = vld [vmem:[#allocation7 + $0xa0] ss:$8 sps:$4 sm:$0xff]  }
  0x42   :  { %417 = vmatprep.subr.bf16.mxu0 %v555_v13  ;;  %v582_v32 = vld [vmem:[#allocation7 + $0xb4] ss:$8 sps:$4 sm:$0xff]   ;;  %v584_v33 = vld [vmem:[#allocation7 + $0xb0] ss:$8 sps:$4 sm:$0xff]   ;;  %v585_v34 = vld [vmem:[#allocation7 + $0xc4] ss:$8 sps:$4 sm:$0xff]  }
  0x43   :  { %v587_v35 = vld [vmem:[#allocation7 + $0xc0] ss:$8 sps:$4 sm:$0xff]   ;;  %v588_v36 = vld [vmem:[#allocation7 + $0xd4] ss:$8 sps:$4 sm:$0xff]   ;;  %v590_v37 = vld [vmem:[#allocation7 + $0xd0] ss:$8 sps:$4 sm:$0xff]  }
  0x44   :  { %v591_v38 = vld [vmem:[#allocation7 + $0xe4] ss:$8 sps:$4 sm:$0xff]   ;;  %v593_v39 = vld [vmem:[#allocation7 + $0xe0] ss:$8 sps:$4 sm:$0xff]   ;;  %v594_v40 = vld [vmem:[#allocation7 + $0xf4] ss:$8 sps:$4 sm:$0xff]  }
  0x45   :  { %418 = vmatpush1.bf16.msra.mxu0 %v557_v14  ;;  %v596_v41 = vld [vmem:[#allocation7 + $0xf0] ss:$8 sps:$4 sm:$0xff]   ;;  %v194_v43 = vshrl.u32 %v193_v42, 7  ;;  %v191_v49 = vld [vmem:[%s790_s4] sm:$0x3]  ;;  %vm490_vm3 = vcmask 7168  }
  0x46   :  { %419 = vmatprep.subr.bf16.mxu0 %v558_v15  ;;  %v456_v1 = vld [vmem:[%s793_s7] sm:$0x3] }
  0x47   :  { %504 = vmatmul.mubr.msk.bf16.vlgmr.msra.gmra.mrb[4].mxu1 %vm146_vm2, %v74_v16  ;;  %v195_v48 = vsub.s32 0, %v194_v43  ;;  %v199_v50 = vsub.s32 1, %v194_v43  ;;  %v457_v2 = vunpack.c.l.bf16 %v456_v1  ;;  %v241_v3 = vld [vmem:[%s792_s6] sm:$0x3]  ;;  %v465_v4 = vsub.s32 2, %v194_v43 }
  0x49   :  { %420 = vmatpush1.bf16.msra.mxu0 %v560_v17  ;;  %v196_v51 = vrot.slane %v191_v49, %v195_v48  ;;  %v200_v53 = vrot.slane %v191_v49, %v199_v50  ;;  %v246_v5 = vrot.slane %v241_v3, %v195_v48  ;;  %v462_v6 = vrot.slane %v457_v2, %v195_v48 }
  0x4a   :  { %421 = vmatprep.subr.bf16.mxu0 %v561_v18  ;;  %v250_v7 = vrot.slane %v241_v3, %v199_v50  ;;  %v466_v8 = vrot.slane %v457_v2, %v465_v4 }
  0x4b   :  { %v472_v12 = vrot.slane %v462_v6, %v195_v48 }
  0x4c   :  { %v476_v15 = vrot.slane %v466_v8, %v195_v48 }
  0x4d   :  { %422 = vmatpush1.bf16.msra.mxu0 %v563_v19 }
  0x4e   :  { %423 = vmatprep.subr.bf16.mxu0 %v564_v20 }
  0x51   :  { %424 = vmatpush1.bf16.msra.mxu0 %v566_v21 }
  0x52   :  { %425 = vmatprep.subr.bf16.mxu0 %v567_v22  ;;  %v537_v22 = vld [vmem:[#allocation2] ss:$0 sm:$0xff] }
  0x55   :  { %426 = vmatpush1.bf16.msra.mxu0 %v569_v23 }
  0x56   :  { %427 = vmatprep.subr.bf16.mxu0 %v570_v24 }
  0x59   :  { %428 = vmatpush1.bf16.msra.mxu0 %v572_v25 }
  0x5a   :  { %429 = vmatprep.subr.bf16.mxu0 %v573_v26 }
  0x5d   :  { %430 = vmatpush1.bf16.msra.mxu0 %v575_v27 }
  0x5e   :  { %431 = vmatprep.subr.bf16.mxu0 %v576_v28 }
  0x61   :  { %432 = vmatpush1.bf16.msra.mxu0 %v578_v29 }
  0x62   :  { %433 = vmatprep.subr.bf16.mxu0 %v579_v30 }
  0x65   :  { %434 = vmatpush1.bf16.msra.mxu0 %v581_v31 }
  0x66   :  { %435 = vmatprep.subr.bf16.mxu0 %v582_v32 }
  0x69   :  { %436 = vmatpush1.bf16.msra.mxu0 %v584_v33 }
  0x6a   :  { %437 = vmatprep.subr.bf16.mxu0 %v585_v34 }
  0x6d   :  { %438 = vmatpush1.bf16.msra.mxu0 %v587_v35 }
  0x6e   :  { %439 = vmatprep.subr.bf16.mxu0 %v588_v36 }
  0x71   :  { %440 = vmatpush1.bf16.msra.mxu0 %v590_v37 }
  0x72   :  { %441 = vmatprep.subr.bf16.mxu0 %v591_v38 }
  0x75   :  { %442 = vmatpush1.bf16.msra.mxu0 %v593_v39 }
  0x76   :  { %443 = vmatprep.subr.bf16.mxu0 %v594_v40 }
  0x79   :  { %444 = vmatpush1.bf16.msra.mxu0 %v596_v41 }
 0x112   :  { %v129_v44 = vpop.f32.mrb[0].mxu1 }
 0x113   :  { %v131_v45 = vpop.f32.mrb[1].mxu1 }
 0x114   :  { %v133_v46 = vpop.f32.mrb[2].mxu1 }
 0x115   :  { %v134_v47 = vpop.f32.mrb[3].mxu1 }
 0x11a   :  { %v184_v52 = vpop.f32.mrb[4].mxu1 }
 0x11b   :  { %v185_v54 = vadd.f32 %v184_v52, %v129_v44  ;;  %v186_v55 = vpop.f32.mrb[5].mxu1 }
 0x11c   :  { %v187_v56 = vadd.f32 %v186_v55, %v131_v45  ;;  %v188_v57 = vpop.f32.mrb[6].mxu1 }
 0x11d   :  { %v203_v58 = vadd.f32 %v196_v51, %v185_v54  ;;  %v189_v59 = vpop.f32.mrb[7].mxu1 }
 0x11e   :  { %v204_v60 = vadd.f32 %v200_v53, %v187_v56 }
 0x11f   :  { %v205_v61 = vmax.f32 %v203_v58, 0.0 }
 0x120   :  { %v206_v62 = vmax.f32 %v204_v60, 0.0 }
 0x121   :  { %v207_v0 = vpack.c.bf16 %v205_v61, %v205_v61 }
 0x122   :  { %v208_v63 = vpack.c.bf16 %v206_v62, %v206_v62 }
 0x124   :  { %445 = vmatprep.mubr.bf16.mxu0 %v208_v63 }
 0x125   :  { %446 = vmatmul.mubr.bf16.vlgmr.msra.gmra.mrb[0].mxu0 %v207_v0 }
 0x1f8   :  { %v447_v9 = vpop.f32.mrb[0].mxu0 }
 0x1f9   :  { %v448_v10 = vadd.f32 %v447_v9, %v246_v5  ;;  %v449_v11 = vpop.f32.mrb[1].mxu0 }
 0x1fa   :  { %v450_v13 = vadd.f32 %v449_v11, %v250_v7  ;;  %v451_v14 = vpop.f32.mrb[2].mxu0 }
 0x1fb   :  { %v454_v16 = vmax.f32 %v448_v10, 0.0  ;;  %v452_v17 = vpop.f32.mrb[3].mxu0 }
 0x1fc   :  { %v455_v18 = vmax.f32 %v450_v13, 0.0 }
 0x1fd   :  { %v477_v19 = vmul.f32 %v472_v12, %v454_v16 }
 0x1fe   :  { %v478_v20 = vmul.f32 %v476_v15, %v455_v18 }
 0x200   :  { %v479_v21 = vadd.f32 %v478_v20, %v477_v19 }
 0x202   :  { %480 = vadd.xlane.f32.xlu0 %v479_v21 }
 0x28f   :  { %v481_v23 = vpop.xlane.xlu0 %480 }
 0x290   :  { %v489_v24 = vadd.f32 %v537_v22, %v481_v23 }
 0x292   :  { %491 = vst.msk [vmem:[%s795_s9] sm:$0xff] %vm490_vm3, %v489_v24 }
 0x293   :  { %496 = vsyncpa [#allocation4], 1 }
 0x294   :  { %497 = vsyncpa [#allocation6], 1 }

</bundles_post_ra>
